<compile_context>
chip_gen: v7x
topology: tpu7x:2x2x1
jax: 0.10.0
libtpu: 0.0.40
codegen_flags: <defaults>
</compile_context>

<pallas_src>
import jax
import jax.numpy as jnp
from jax.experimental import pallas as pl
from jax.experimental.pallas import tpu as pltpu

ACTION_SIZE = 16            # cfg.ACTION_SIZE
HIDDEN1 = 64
HIDDEN2 = 32
HEADS = 1 + ACTION_SIZE     # fused heads: row 0 = value, rows 1: = policy


def _mlp_fused_kernel(xT_ref, w1_ref, b1_ref, w2_ref, b2_ref, wh_ref, bh_ref,
                      outT_ref):
    # xT: [ACTION_SIZE, TB] bf16, batch on lanes. Weights in torch layout [out, in].
    xT = xT_ref[...]

    # Linear(ACTION_SIZE, 64) + ReLU
    h1 = jnp.dot(w1_ref[...], xT, preferred_element_type=jnp.float32) + b1_ref[...]
    h1 = jnp.maximum(h1, 0.0).astype(jnp.bfloat16)                     # [64, TB]

    # Linear(64, 32)
    logits = jnp.dot(w2_ref[...], h1, preferred_element_type=jnp.float32) + b2_ref[...]

    # Shared ReLU feeding both heads, then one fused head matmul.
    z = jnp.maximum(logits, 0.0).astype(jnp.bfloat16)                  # [32, TB]
    outT_ref[...] = (jnp.dot(wh_ref[...], z, preferred_element_type=jnp.float32)
                     + bh_ref[...]).astype(outT_ref.dtype)             # [17, TB]


def neural_network_forward(x, params, *, tb=None):
    """x: [B, ...] flattening to [B, ACTION_SIZE].
    Returns (value [B, 1], actions [B, ACTION_SIZE])."""
    B = x.shape[0]
    x_flat = x.reshape(B, -1).astype(jnp.float32)        # nn.Flatten()
    assert x_flat.shape[1] == ACTION_SIZE

    w1, b1, w2, b2, wv, bv, wp, bp = params
    # Fuse value + policy heads into one matmul.
    wh = jnp.concatenate([wv, wp], axis=0)               # [HEADS, HIDDEN2]
    bh = jnp.concatenate([bv, bp], axis=0)               # [HEADS, 1]

    # Batch tile size (lane axis). Pad batch up to a multiple of tb (>=128).
    if tb is None:
        tb = 2048 if B >= 2048 else max(128, int(pl.next_power_of_2(B)))
    n_tiles = pl.cdiv(B, tb)
    B_pad = n_tiles * tb

    # Feature-major bf16 input, zero-padded batch columns (sliced off afterwards).
    xT = jnp.zeros((ACTION_SIZE, B_pad), jnp.bfloat16)
    xT = xT.at[:, :B].set(x_flat.T.astype(jnp.bfloat16))

    w1b = w1.astype(jnp.bfloat16)
    w2b = w2.astype(jnp.bfloat16)
    whb = wh.astype(jnp.bfloat16)
    b1f = b1.astype(jnp.float32)
    b2f = b2.astype(jnp.float32)
    bhf = bh.astype(jnp.float32)

    resident = lambda i: (0, 0)   # weights/biases stay in VMEM across grid steps

    flops = int(2 * B_pad * (ACTION_SIZE * HIDDEN1
                             + HIDDEN1 * HIDDEN2
                             + HIDDEN2 * HEADS))
    bytes_accessed = int(xT.size * 2 + B_pad * HEADS * 4
                         + (w1b.size + w2b.size + whb.size) * 2
                         + (b1f.size + b2f.size + bhf.size) * 4)

    outT = pl.pallas_call(
        _mlp_fused_kernel,
        out_shape=jax.ShapeDtypeStruct((HEADS, B_pad), jnp.float32),
        grid=(n_tiles,),
        in_specs=[
            pl.BlockSpec((ACTION_SIZE, tb), lambda i: (0, i)),   # xT (pipelined)
            pl.BlockSpec((HIDDEN1, ACTION_SIZE), resident),      # w1
            pl.BlockSpec((HIDDEN1, 1), resident),                # b1
            pl.BlockSpec((HIDDEN2, HIDDEN1), resident),          # w2
            pl.BlockSpec((HIDDEN2, 1), resident),                # b2
            pl.BlockSpec((HEADS, HIDDEN2), resident),            # fused head weight
            pl.BlockSpec((HEADS, 1), resident),                  # fused head bias
        ],
        out_specs=pl.BlockSpec((HEADS, tb), lambda i: (0, i)),
        compiler_params=pltpu.CompilerParams(
            dimension_semantics=("parallel",)),
        cost_estimate=pl.CostEstimate(flops=flops, transcendentals=0,
                                      bytes_accessed=bytes_accessed),
    )(xT, w1b, b1f, w2b, b2f, whb, bhf)

    out = outT[:, :B].T           # [B, HEADS]
    value = out[:, 0:1]           # [B, 1]
    actions = out[:, 1:]          # [B, ACTION_SIZE]
    return value, actions


def init_params(key):
    """PyTorch-Linear-style init: uniform(-1/sqrt(fan_in), +1/sqrt(fan_in)).
    Weights stored in torch layout [out, in]; biases as columns [out, 1]."""
    def linear(key, fan_in, fan_out):
        kw, kb = jax.random.split(key)
        bound = 1.0 / jnp.sqrt(float(fan_in))
        w = jax.random.uniform(kw, (fan_out, fan_in), jnp.float32, -bound, bound)
        b = jax.random.uniform(kb, (fan_out, 1), jnp.float32, -bound, bound)
        return w, b

    k1, k2, k3, k4 = jax.random.split(key, 4)
    w1, b1 = linear(k1, ACTION_SIZE, HIDDEN1)   # Linear(ACTION_SIZE, 64)
    w2, b2 = linear(k2, HIDDEN1, HIDDEN2)       # Linear(64, 32)
    wv, bv = linear(k3, HIDDEN2, 1)             # Linear(32, 1)
    wp, bp = linear(k4, HIDDEN2, ACTION_SIZE)   # Linear(32, ACTION_SIZE)
    return (w1, b1, w2, b2, wv, bv, wp, bp)


def _reference_forward(x, params):
    """Pure-JAX f32 reference for validation (torch-layout weights)."""
    w1, b1, w2, b2, wv, bv, wp, bp = params
    xf = x.reshape(x.shape[0], -1).astype(jnp.float32)
    h1 = jnp.maximum(xf @ w1.T + b1[:, 0], 0.0)
    logits = h1 @ w2.T + b2[:, 0]
    z = jnp.maximum(logits, 0.0)
    return z @ wv.T + bv[:, 0], z @ wp.T + bp[:, 0]


if __name__ == "__main__":
    key = jax.random.PRNGKey(0)
    kx, kp = jax.random.split(key)

    B = 8
    # input shaped like a small grid that flattens to ACTION_SIZE features
    x = jax.random.normal(kx, (B, 4, 4), dtype=jnp.float32)   # flatten -> (B, 16)
    params = init_params(kp)

    value, actions = neural_network_forward(x, params)
    jax.block_until_ready((value, actions))

    v_ref, a_ref = _reference_forward(x, params)
    assert value.shape == (B, 1) and actions.shape == (B, ACTION_SIZE)
    # bf16 operands / f32 accumulation -> loosened tolerance vs f32 reference
    assert jnp.allclose(value, v_ref, atol=2e-2, rtol=2e-2)
    assert jnp.allclose(actions, a_ref, atol=2e-2, rtol=2e-2)

    print("KERNEL_OK")
</pallas_src>

<mosaic_0001>
module attributes {stable_mosaic.version = 11 : i64} {
  func.func @_mlp_fused_kernel(%arg0: i32, %arg1: memref<16x128xbf16, #tpu.memory_space<vmem>>, %arg2: memref<64x16xbf16, #tpu.memory_space<vmem>>, %arg3: memref<64x1xf32, #tpu.memory_space<vmem>>, %arg4: memref<32x64xbf16, #tpu.memory_space<vmem>>, %arg5: memref<32x1xf32, #tpu.memory_space<vmem>>, %arg6: memref<17x32xbf16, #tpu.memory_space<vmem>>, %arg7: memref<17x1xf32, #tpu.memory_space<vmem>>, %arg8: memref<17x128xf32, #tpu.memory_space<vmem>>) attributes {dimension_semantics = [#tpu.dimension_semantics<parallel>], iteration_bounds = array<i64: 1>, scalar_prefetch = 0 : i64, scratch_operands = 0 : i64, tpu.core_type = #tpu.core_type<tc>, window_params = [{transform_indices = @transform_0, window_bounds = array<i64: 16, 128>}, {pipeline_mode = #tpu.pipeline_mode<synchronous>, transform_indices = @transform_1, window_bounds = array<i64: 64, 16>}, {pipeline_mode = #tpu.pipeline_mode<synchronous>, transform_indices = @transform_2, window_bounds = array<i64: 64, 1>}, {pipeline_mode = #tpu.pipeline_mode<synchronous>, transform_indices = @transform_3, window_bounds = array<i64: 32, 64>}, {pipeline_mode = #tpu.pipeline_mode<synchronous>, transform_indices = @transform_4, window_bounds = array<i64: 32, 1>}, {pipeline_mode = #tpu.pipeline_mode<synchronous>, transform_indices = @transform_5, window_bounds = array<i64: 17, 32>}, {pipeline_mode = #tpu.pipeline_mode<synchronous>, transform_indices = @transform_6, window_bounds = array<i64: 17, 1>}, {transform_indices = @transform_7, window_bounds = array<i64: 17, 128>}]} {
    %c0 = arith.constant 0 : index
    %c0_0 = arith.constant 0 : index
    %0 = vector.load %arg1[%c0, %c0_0] : memref<16x128xbf16, #tpu.memory_space<vmem>>, vector<16x128xbf16>
    %c0_1 = arith.constant 0 : index
    %c0_2 = arith.constant 0 : index
    %1 = vector.load %arg2[%c0_1, %c0_2] : memref<64x16xbf16, #tpu.memory_space<vmem>>, vector<64x16xbf16>
    %cst = arith.constant dense<0.000000e+00> : vector<64x128xf32>
    %2 = tpu.matmul %1, %0, %cst {dimension_numbers = #tpu.dot_dimension_numbers<[1], [0], [0], [1], [0, 0, 1, 1], [], []>} : vector<64x16xbf16>, vector<16x128xbf16>, vector<64x128xf32> -> vector<64x128xf32>
    %c0_3 = arith.constant 0 : index
    %c0_4 = arith.constant 0 : index
    %3 = vector.load %arg3[%c0_3, %c0_4] : memref<64x1xf32, #tpu.memory_space<vmem>>, vector<64x1xf32>
    %4 = vector.broadcast %3 : vector<64x1xf32> to vector<64x128xf32>
    %5 = arith.addf %2, %4 : vector<64x128xf32>
    %cst_5 = arith.constant 0.000000e+00 : f32
    %6 = vector.broadcast %cst_5 : f32 to vector<64x128xf32>
    %7 = arith.maximumf %5, %6 : vector<64x128xf32>
    %8 = arith.truncf %7 : vector<64x128xf32> to vector<64x128xbf16>
    %c0_6 = arith.constant 0 : index
    %c0_7 = arith.constant 0 : index
    %9 = vector.load %arg4[%c0_6, %c0_7] : memref<32x64xbf16, #tpu.memory_space<vmem>>, vector<32x64xbf16>
    %cst_8 = arith.constant dense<0.000000e+00> : vector<32x128xf32>
    %10 = tpu.matmul %9, %8, %cst_8 {dimension_numbers = #tpu.dot_dimension_numbers<[1], [0], [0], [1], [0, 0, 1, 1], [], []>} : vector<32x64xbf16>, vector<64x128xbf16>, vector<32x128xf32> -> vector<32x128xf32>
    %c0_9 = arith.constant 0 : index
    %c0_10 = arith.constant 0 : index
    %11 = vector.load %arg5[%c0_9, %c0_10] : memref<32x1xf32, #tpu.memory_space<vmem>>, vector<32x1xf32>
    %12 = vector.broadcast %11 : vector<32x1xf32> to vector<32x128xf32>
    %13 = arith.addf %10, %12 : vector<32x128xf32>
    %cst_11 = arith.constant 0.000000e+00 : f32
    %14 = vector.broadcast %cst_11 : f32 to vector<32x128xf32>
    %15 = arith.maximumf %13, %14 : vector<32x128xf32>
    %16 = arith.truncf %15 : vector<32x128xf32> to vector<32x128xbf16>
    %c0_12 = arith.constant 0 : index
    %c0_13 = arith.constant 0 : index
    %17 = vector.load %arg6[%c0_12, %c0_13] : memref<17x32xbf16, #tpu.memory_space<vmem>>, vector<17x32xbf16>
    %cst_14 = arith.constant dense<0.000000e+00> : vector<17x128xf32>
    %18 = tpu.matmul %17, %16, %cst_14 {dimension_numbers = #tpu.dot_dimension_numbers<[1], [0], [0], [1], [0, 0, 1, 1], [], []>} : vector<17x32xbf16>, vector<32x128xbf16>, vector<17x128xf32> -> vector<17x128xf32>
    %c0_15 = arith.constant 0 : index
    %c0_16 = arith.constant 0 : index
    %19 = vector.load %arg7[%c0_15, %c0_16] : memref<17x1xf32, #tpu.memory_space<vmem>>, vector<17x1xf32>
    %20 = vector.broadcast %19 : vector<17x1xf32> to vector<17x128xf32>
    %21 = arith.addf %18, %20 : vector<17x128xf32>
    %c0_17 = arith.constant 0 : index
    %c0_18 = arith.constant 0 : index
    %22 = vector.load %arg8[%c0_17, %c0_18] : memref<17x128xf32, #tpu.memory_space<vmem>>, vector<17x128xf32>
    tpu.vector_store %arg8[%c0_17, %c0_18], %21 {strides = array<i32>} : memref<17x128xf32, #tpu.memory_space<vmem>>, vector<17x128xf32>,
    return
  }
  func.func @transform_0(%arg0: i32) -> (i32, i32) {
    %c0_i32 = arith.constant 0 : i32
    %c0_i32_0 = arith.constant 0 : i32
    return %c0_i32, %arg0 : i32, i32
  }
  func.func @transform_1(%arg0: i32) -> (i32, i32) {
    %c0_i32 = arith.constant 0 : i32
    %c0_i32_0 = arith.constant 0 : i32
    %c0_i32_1 = arith.constant 0 : i32
    return %c0_i32, %c0_i32_0 : i32, i32
  }
  func.func @transform_2(%arg0: i32) -> (i32, i32) {
    %c0_i32 = arith.constant 0 : i32
    %c0_i32_0 = arith.constant 0 : i32
    %c0_i32_1 = arith.constant 0 : i32
    return %c0_i32, %c0_i32_0 : i32, i32
  }
  func.func @transform_3(%arg0: i32) -> (i32, i32) {
    %c0_i32 = arith.constant 0 : i32
    %c0_i32_0 = arith.constant 0 : i32
    %c0_i32_1 = arith.constant 0 : i32
    return %c0_i32, %c0_i32_0 : i32, i32
  }
  func.func @transform_4(%arg0: i32) -> (i32, i32) {
    %c0_i32 = arith.constant 0 : i32
    %c0_i32_0 = arith.constant 0 : i32
    %c0_i32_1 = arith.constant 0 : i32
    return %c0_i32, %c0_i32_0 : i32, i32
  }
  func.func @transform_5(%arg0: i32) -> (i32, i32) {
    %c0_i32 = arith.constant 0 : i32
    %c0_i32_0 = arith.constant 0 : i32
    %c0_i32_1 = arith.constant 0 : i32
    return %c0_i32, %c0_i32_0 : i32, i32
  }
  func.func @transform_6(%arg0: i32) -> (i32, i32) {
    %c0_i32 = arith.constant 0 : i32
    %c0_i32_0 = arith.constant 0 : i32
    %c0_i32_1 = arith.constant 0 : i32
    return %c0_i32, %c0_i32_0 : i32, i32
  }
  func.func @transform_7(%arg0: i32) -> (i32, i32) {
    %c0_i32 = arith.constant 0 : i32
    %c0_i32_0 = arith.constant 0 : i32
    return %c0_i32, %arg0 : i32, i32
  }
}

</mosaic_0001>

<bundles_post_ra>
// kernel: tpu_custom_call.1
= control target key start
LH: loop header
LB: loop body
LE: loop exit
PB: predicated region body
PF: predicated region fallthrough
CT: control target
= control target key end

     0   :  { %vm112_vm0 = vcmask 130048   ;;  %v506_v3 = vmov 0   ;;  %s642_s0 = inlined_call_operand.vmem [shape: bf16[16,128], index: 0, kind: input, shape index: {}]   ;;  %s643_s1 = inlined_call_operand.vmem [shape: bf16[64,16], index: 1, kind: input, shape index: {}]   ;;  %s644_s2 = inlined_call_operand.vmem [shape: f32[64,1], index: 2, kind: input, shape index: {}]   ;;  %s645_s3 = inlined_call_operand.vmem [shape: bf16[32,64], index: 3, kind: input, shape index: {}]   ;;  %s646_s4 = inlined_call_operand.vmem [shape: f32[32,1], index: 4, kind: input, shape index: {}]   ;;  %s647_s5 = inlined_call_operand.vmem [shape: bf16[17,32], index: 5, kind: input, shape index: {}]   ;;  %s648_s6 = inlined_call_operand.vmem [shape: f32[17,1], index: 6, kind: input, shape index: {}]   ;;  %s649_s7 = inlined_call_operand.hbm [shape: f32[17,128], index: 7, kind: output, shape index: {}]  }
   0x1   :  { %v473_v0 = vld [vmem:[%s642_s0] sm:$0xff]   ;;  %v475_v2 = vld [vmem:[%s643_s1 + $0x8] sm:$0xff]   ;;  %471 = vset.pattern.permute.xlu0 %v506_v3  ;;  %v476_v4 = vld [vmem:[%s643_s1 + $0x10] sm:$0xff]   ;;  %472 = vset.pattern.permute.xlu1 %v506_v3 }
   0x2   :  { %v474_v1 = vld [vmem:[%s643_s1] sm:$0xff]   ;;  %437 = vmatprep.subr.bf16.mxu0 %v473_v0  ;;  %v40_v6 = vld [vmem:[%s644_s2 + $0x10] sm:$0xff]  ;;  %v39_v7 = vld [vmem:[%s644_s2 + $0x8] sm:$0xff] }
   0x3   :  { %438 = vmatpush3.bf16.msra.mxu0 %v473_v0  ;;  %439 = vmatprep.mubr.msk.bf16.mxu0 %vm112_vm0, %v474_v1  ;;  %v38_v5 = vld [vmem:[%s644_s2] sm:$0xff]  ;;  %v41_v8 = vld [vmem:[%s644_s2 + $0x18] sm:$0xff]  ;;  %v43_v11 = vld [vmem:[%s644_s2 + $0x28] sm:$0xff] }
   0x4   :  { %48 = vperm.xlu0 %471, %v38_v5   ;;  %58 = vperm.xlu1 %472, %v40_v6   ;;  %v477_v9 = vld [vmem:[%s643_s1 + $0x18] sm:$0xff]   ;;  %v42_v10 = vld [vmem:[%s644_s2 + $0x20] sm:$0xff] }
   0x6   :  { %440 = vmatmul.mubr.msk.bf16.vlgmr.msra.gmra.mrb[0].mxu0 %vm112_vm0, %v475_v2 }
   0x7   :  { %443 = vmatprep.mubr.msk.bf16.mxu0 %vm112_vm0, %v476_v4 }
   0x8   :  { %53 = vperm.xlu0 %471, %v39_v7   ;;  %63 = vperm.xlu1 %472, %v41_v8  }
   0x9   :  { %12 = vsyncpa [#allocation3], 0  ;;  %v44_v12 = vld [vmem:[%s644_s2 + $0x30] sm:$0xff]  ;;  %v45_v13 = vld [vmem:[%s644_s2 + $0x38] sm:$0xff]  ;;  %vm240_vm1 = vcmask 523264   ;;  %vm331_vm2 = vcmask 261120  }
   0xa   :  { %v206_v14 = vld [vmem:[%s646_s4] sm:$0xff]  ;;  %v207_v15 = vld [vmem:[%s646_s4 + $0x8] sm:$0xff]  ;;  %v208_v16 = vld [vmem:[%s646_s4 + $0x10] sm:$0xff]  ;;  %s507_s19 = smov [#allocation2]  }
   0xb   :  { %v209_v17 = vld [vmem:[%s646_s4 + $0x18] sm:$0xff]  ;;  %v305_v18 = vld [vmem:[%s648_s6] sm:$0xff]  ;;  %v306_v19 = vld [vmem:[%s648_s6 + $0x8] sm:$0xff]  ;;  %s394_s20 = sshll.u32 %s507_s19, 4  ;;  %s395_s20 = int_to_ptr.vmem [resolvable:$true] %s394_s20 }
   0xc   :  { %68 = vperm.xlu0 %471, %v42_v10   ;;  %73 = vperm.xlu1 %472, %v43_v11   ;;  %v307_v20 = vld [vmem:[%s648_s6 + $0x10] sm:$0x1]  ;;  %v478_v21 = vld [vmem:[%s645_s3] sm:$0xff]   ;;  %v479_v58 = vld [vmem:[%s645_s3 + $0x8] sm:$0xff]   ;;  %p487_p1 = scmp.lt.s32.totalorder %s395_s20, %s395_s20 }
   0xd   :  { %455 = vmatprep.mubr.msk.bf16.mxu1 %vm240_vm1, %v478_v21  ;;  %v480_v59 = vld [vmem:[%s647_s5] sm:$0xff]  }
   0xe   :  { %444 = vmatmul.mubr.msk.bf16.gmra.mrb[4].mxu0 %vm112_vm0, %v477_v9 }
   0xf   :  { %463 = vmatprep.mubr.msk.bf16.mxu0 %vm331_vm2, %v480_v59 }
  0x10   :  { %78 = vperm.xlu0 %471, %v44_v12   ;;  %83 = vperm.xlu1 %472, %v45_v13  }
  0x14   :  { %212 = vperm.xlu0 %471, %v206_v14   ;;  %217 = vperm.xlu1 %472, %v207_v15   ;;  %v481_v14 = vld [vmem:[%s647_s5 + $0x8] ss:$0 sps:$4 sm:$0x11]   ;;  %s482_s5 = scalar_lea.vmem %s395_s20, 384 }
  0x15   :  { %p483_p0 = scmp.ne.s32.totalorder %s395_s20, %s482_s5  ;;  %p488_p2 = scmp.lt.s32.totalorder %s482_s5, %s482_s5 }
  0x17   :  { %p489_p3 = por %p488_p2, %p487_p1 }
  0x18   :  { %222 = vperm.xlu0 %471, %v208_v16   ;;  %227 = vperm.xlu1 %472, %v209_v17  }
  0x19   :  { %p490_p4 = pnand %p489_p3, %p483_p0 }
  0x1c   :  { %310 = vperm.xlu0 %471, %v305_v18   ;;  %315 = vperm.xlu1 %472, %v306_v19  }
  0x20   :  { %320 = vperm.xlu0 %471, %v307_v20  }
  0x83   :  { %v49_v22 = vpop.permute.xlu0 %48  ;;  %v59_v23 = vpop.permute.xlu1 %58 }
  0x87   :  { %v54_v24 = vpop.permute.xlu0 %53  ;;  %v64_v25 = vpop.permute.xlu1 %63 }
  0x8b   :  { %v69_v29 = vpop.permute.xlu0 %68  ;;  %v74_v34 = vpop.permute.xlu1 %73 }
  0x8f   :  { %v79_v41 = vpop.permute.xlu0 %78  ;;  %v84_v46 = vpop.permute.xlu1 %83 }
  0x93   :  { %v213_v60 = vpop.permute.xlu0 %212  ;;  %v218_v61 = vpop.permute.xlu1 %217 }
  0x97   :  { %v223_v62 = vpop.permute.xlu0 %222  ;;  %v228_v2 = vpop.permute.xlu1 %227 }
  0x9b   :  { %v311_v15 = vpop.permute.xlu0 %310 }
  0x9f   :  { %v321_v16 = vpop.permute.xlu0 %320 }
  0xd9   :  { %v441_v26 = vpop.f32.mrb[0].mxu0 }
  0xda   :  { %v168_v27 = vadd.f32 %v441_v26, %v59_v23  ;;  %v159_v28 = vpop.f32.mrb[1].mxu0 }
  0xdb   :  { %v160_v30 = vadd.f32 %v159_v28, %v49_v22  ;;  %v442_v31 = vpop.f32.mrb[2].mxu0  ;;  %v316_v22 = vpop.permute.xlu1 %315 }
  0xdc   :  { %v171_v32 = vadd.f32 %v442_v31, %v64_v25  ;;  %v162_v33 = vpop.f32.mrb[3].mxu0  ;;  %v192_v36 = vmax.f32 %v168_v27, 0.0 }
  0xdd   :  { %v163_v35 = vadd.f32 %v162_v33, %v54_v24  ;;  %v190_v38 = vmax.f32 %v160_v30, 0.0 }
  0xde   :  { %v193_v37 = vmax.f32 %v171_v32, 0.0 }
  0xdf   :  { %v191_v39 = vmax.f32 %v163_v35, 0.0 }
  0xe0   :  { %v199_v40 = vpack.c.bf16 %v193_v37, %v192_v36 }
  0xe1   :  { %v445_v42 = vpop.f32.mrb[4].mxu0  ;;  %v198_v43 = vpack.c.bf16 %v191_v39, %v190_v38 }
  0xe2   :  { %v184_v44 = vadd.f32 %v445_v42, %v79_v41  ;;  %v175_v45 = vpop.f32.mrb[5].mxu0 }
  0xe3   :  { %v176_v47 = vadd.f32 %v175_v45, %v69_v29  ;;  %v446_v48 = vpop.f32.mrb[6].mxu0  ;;  %447 = vmatprep.subr.bf16.mxu1 %v198_v43 }
  0xe4   :  { %v187_v49 = vadd.f32 %v446_v48, %v84_v46  ;;  %v178_v50 = vpop.f32.mrb[7].mxu0  ;;  %448 = vmatpush3.bf16.msra.mxu1 %v198_v43  ;;  %v196_v52 = vmax.f32 %v184_v44, 0.0 }
  0xe5   :  { %v179_v51 = vadd.f32 %v178_v50, %v74_v34  ;;  %449 = vmatprep.subr.bf16.mxu1 %v199_v40  ;;  %v194_v54 = vmax.f32 %v176_v47, 0.0 }
  0xe6   :  { %v197_v53 = vmax.f32 %v187_v49, 0.0 }
  0xe7   :  { %v195_v55 = vmax.f32 %v179_v51, 0.0 }
  0xe8   :  { %v201_v56 = vpack.c.bf16 %v197_v53, %v196_v52  ;;  %450 = vmatpush3.bf16.msra.mxu1 %v199_v40 }
  0xe9   :  { %v200_v57 = vpack.c.bf16 %v195_v55, %v194_v54 }
  0xeb   :  { %451 = vmatprep.subr.bf16.mxu1 %v200_v57 }
  0xec   :  { %452 = vmatpush3.bf16.msra.mxu1 %v200_v57 }
  0xed   :  { %453 = vmatprep.subr.bf16.mxu1 %v201_v56 }
  0xf0   :  { %454 = vmatpush3.bf16.msra.mxu1 %v201_v56 }
  0xf3   :  { %456 = vmatmul.mubr.msk.bf16.vlgmr.msra.gmra.mrb[0].mxu1 %vm240_vm1, %v479_v58 }
 0x1c6   :  { %v457_v63 = vpop.f32.mrb[0].mxu1 }
 0x1c7   :  { %v290_v0 = vadd.f32 %v457_v63, %v223_v62  ;;  %v281_v1 = vpop.f32.mrb[1].mxu1 }
 0x1c8   :  { %v282_v3 = vadd.f32 %v281_v1, %v213_v60  ;;  %v458_v4 = vpop.f32.mrb[2].mxu1 }
 0x1c9   :  { %v293_v5 = vadd.f32 %v458_v4, %v228_v2  ;;  %v284_v6 = vpop.f32.mrb[3].mxu1  ;;  %v298_v8 = vmax.f32 %v290_v0, 0.0 }
 0x1ca   :  { %v285_v7 = vadd.f32 %v284_v6, %v218_v61  ;;  %v296_v10 = vmax.f32 %v282_v3, 0.0 }
 0x1cb   :  { %v299_v9 = vmax.f32 %v293_v5, 0.0 }
 0x1cc   :  { %v297_v11 = vmax.f32 %v285_v7, 0.0 }
 0x1cd   :  { %v301_v12 = vpack.c.bf16 %v299_v9, %v298_v8 }
 0x1ce   :  { %v300_v13 = vpack.c.bf16 %v297_v11, %v296_v10 }
 0x1d0   :  { %459 = vmatprep.subr.bf16.mxu0 %v300_v13 }
 0x1d1   :  { %460 = vmatpush3.bf16.msra.mxu0 %v300_v13 }
 0x1d2   :  { %461 = vmatprep.subr.bf16.mxu0 %v301_v12 }
 0x1d5   :  { %462 = vmatpush3.bf16.msra.mxu0 %v301_v12 }
 0x1d8   :  { %464 = vmatmul.mubr.msk.bf16.vlgmr.msra.gmra.mrb[8].mxu0 %vm331_vm2, %v481_v14 }
 0x2ab   :  { %v465_v17 = vpop.f32.mrb[8].mxu0 }
 0x2ac   :  { %v381_v18 = vadd.f32 %v465_v17, %v321_v16  ;;  %v372_v19 = vpop.f32.mrb[9].mxu0 }
 0x2ad   :  { %v373_v20 = vadd.f32 %v372_v19, %v311_v15  ;;  %v466_v21 = vpop.f32.mrb[10].mxu0 }
 0x2ae   :  { %388 = vst [vmem:[#allocation2 + $0x10] sm:$0x1] %v381_v18  ;;  %v375_v23 = vpop.f32.mrb[11].mxu0 }
 0x2af   :  { %386 = vst [vmem:[#allocation2] sm:$0xff] %v373_v20  ;;  %v376_v24 = vadd.f32 %v375_v23, %v316_v22 }
 0x2b1   :  { %387 = vst [vmem:[#allocation2 + $0x8] sm:$0xff] %v376_v24 }
 0x2b2   :  { %493 = shalt.err (!%p490_p4)
}
 0x2b3   :  { %s494_s23 = scalar_lea.hbm %s649_s7, 384 }
 0x2b4   :  { %p495_p5 = scmp.ne.s32.totalorder %s649_s7, %s494_s23  ;;  %p498_p6 = scmp.lt.u32.totalorder %s494_s23, %s649_s7 }
 0x2b6   :  { %p500_p7 = pnand %p498_p6, %p495_p5 }
 0x2b8   :  { %503 = shalt.err (!%p500_p7)
}
 0x2b9   :  { %s508_s27 = smov 128   ;;  %s509_s28 = smov 8  }
 0x2ba   :  { %400 = dma.vmem_to_hbm [thread:$0]  %s395_s20, 384, %s649_s7, [#allocation3], %s508_s27, %s508_s27, %s509_s28  }
 0x2bb   :  { %504 = dma.done.wait [#allocation3], 384  }
 0x2bc   :  { %505 = vsyncadd [#allocation3], 4294966912 }
 0x2bd   :  { %404 = vsyncpa [#allocation3], 1 }

</bundles_post_ra>
